<compile_context>
chip_gen: v7x
topology: tpu7x:2x2x1
jax: 0.10.0
libtpu: 0.0.40
codegen_flags: <defaults>
</compile_context>

<pallas_src>
import functools

import jax
import jax.numpy as jnp
from jax.experimental import pallas as pl
from jax.experimental.pallas import tpu as pltpu

LANE = 128


def _bce_blur_kernel(p_ref, t_ref, o_ref, acc_ref, *,
                     inv_alpha, total, block_rows, n_inner):
    o = pl.program_id(0)          # outer ("parallel"/CORE_PARALLEL) slab
    i = pl.program_id(1)          # inner ("arbitrary") reduction step

    @pl.when(i == 0)
    def _():
        acc_ref[...] = jnp.zeros_like(acc_ref)

    x = p_ref[...].astype(jnp.float32)
    y = t_ref[...].astype(jnp.float32)

    # Numerically-stable BCE with logits (reduction='none'):
    #   loss = max(x, 0) - x*y + log1p(exp(-|x|))
    e = jnp.exp(-jnp.abs(x))
    loss = jnp.maximum(x, 0.0) - x * y + jnp.log1p(e)

    # sigmoid(x) = 0.5 * tanh(x/2) + 0.5  -- single EUP op, no reciprocal.
    sig = 0.5 * jnp.tanh(0.5 * x) + 0.5

    # Blur factor: 1 - exp((sigmoid(x) - y - 1) * inv_alpha)
    af = 1.0 - jnp.exp((sig - y - 1.0) * inv_alpha)
    val = loss * af

    block_elems = block_rows * LANE
    block_start = (o * n_inner + i) * block_elems
    rem = total - block_start            # valid elements at/after this block
    needs_mask = rem < block_elems       # block touches the ragged tail

    def _fold(v):
        # Tile-aligned reshape (free) + VPU adds -> one (8, LANE) vreg.
        return jnp.sum(v.reshape(block_rows // 8, 8, LANE), axis=0)

    @pl.when(needs_mask)
    def _():
        ridx = jax.lax.broadcasted_iota(jnp.int32, (block_rows, LANE), 0)
        cidx = jax.lax.broadcasted_iota(jnp.int32, (block_rows, LANE), 1)
        idx = ridx * LANE + cidx
        # jnp.where (NOT val*mask): tail data is undefined; Inf*0 would NaN.
        acc_ref[...] += _fold(jnp.where(idx < rem, val, 0.0))

    @pl.when(jnp.logical_not(needs_mask))
    def _():
        acc_ref[...] += _fold(val)

    @pl.when(i == n_inner - 1)
    def _():
        o_ref[...] = acc_ref[...].reshape(1, 8, LANE)


def bce_blur_with_logits_loss(pred, true, alpha=0.05,
                              block_rows=4096, n_outer=1,
                              core_parallel=False):
    """mean( BCEWithLogits(pred,true) * (1 - exp((sigmoid(pred)-true-1)/(alpha+1e-4))) )."""
    assert pred.shape == true.shape
    total = int(pred.size)

    p = pred.reshape(-1)
    t = true.reshape(-1)
    rows = -(-total // LANE)                  # cdiv
    lane_pad = rows * LANE - total
    if lane_pad:
        # Only hit when total % 128 != 0 (pads < 128 elems for the reshape).
        # TODO(synk): fold the <128-elem tail into a tiny side computation to
        # avoid this copy entirely.
        p = jnp.pad(p, (0, lane_pad))
        t = jnp.pad(t, (0, lane_pad))
    p2 = p.reshape(rows, LANE)                # zero-copy when lane_pad == 0
    t2 = t.reshape(rows, LANE)

    # block_rows: multiple of 8, no larger than the (rounded-up) data.
    block_rows = max(8, (int(block_rows) // 8) * 8)
    block_rows = min(block_rows, ((rows + 7) // 8) * 8)

    n_blocks = -(-rows // block_rows)
    n_outer = max(1, min(int(n_outer), n_blocks))
    n_inner = -(-n_blocks // n_outer)

    def blk_map(o, i):
        # Clamp so fully-out-of-range steps (ragged n_blocks/n_outer split)
        # just re-read the last block; the in-kernel mask zeroes them out.
        return (jnp.minimum(o * n_inner + i, n_blocks - 1), 0)

    blk = pl.BlockSpec((block_rows, LANE), blk_map)

    itemsize = jnp.dtype(pred.dtype).itemsize
    cost = pl.CostEstimate(
        flops=14 * total,
        transcendentals=4 * total,
        bytes_accessed=2 * total * itemsize + n_outer * 8 * LANE * 4,
    )

    outer_sem = pltpu.CORE_PARALLEL if core_parallel else pltpu.PARALLEL

    partial = pl.pallas_call(
        functools.partial(_bce_blur_kernel,
                          inv_alpha=1.0 / (float(alpha) + 0.0001),
                          total=total, block_rows=block_rows,
                          n_inner=n_inner),
        out_shape=jax.ShapeDtypeStruct((n_outer, 8, LANE), jnp.float32),
        grid_spec=pltpu.PrefetchScalarGridSpec(
            num_scalar_prefetch=0,
            grid=(n_outer, n_inner),
            in_specs=[blk, blk],
            out_specs=pl.BlockSpec((1, 8, LANE), lambda o, i: (o, 0, 0)),
            scratch_shapes=[pltpu.VMEM((8, LANE), jnp.float32)],
        ),
        compiler_params=pltpu.CompilerParams(
            dimension_semantics=(outer_sem, pltpu.ARBITRARY),
        ),
        cost_estimate=cost,
    )(p2, t2)

    return jnp.sum(partial) / jnp.float32(total)


def _reference(pred, true, alpha=0.05):
    x = pred.astype(jnp.float32)
    y = true.astype(jnp.float32)
    loss = jnp.maximum(x, 0.0) - x * y + jnp.log1p(jnp.exp(-jnp.abs(x)))
    s = jax.nn.sigmoid(x)
    dx = s - y
    af = 1.0 - jnp.exp((dx - 1.0) / (alpha + 0.0001))
    return jnp.mean(loss * af)


if __name__ == "__main__":
    key = jax.random.PRNGKey(0)
    k1, k2 = jax.random.split(key)
    # NCHW-shaped logits / targets, as a conv head would produce.
    pred = jax.random.normal(k1, (2, 4, 16, 16), dtype=jnp.float32)
    true = (jax.random.uniform(k2, (2, 4, 16, 16)) > 0.5).astype(jnp.float32)

    out = bce_blur_with_logits_loss(pred, true, alpha=0.05)
    out = jax.block_until_ready(out)

    ref = _reference(pred, true, alpha=0.05)
    assert jnp.allclose(out, ref, atol=1e-4, rtol=1e-4), (out, ref)
    print("KERNEL_OK")
</pallas_src>

<mosaic_0001>
module attributes {stable_mosaic.version = 11 : i64} {
  func.func @_bce_blur_kernel(%arg0: i32, %arg1: i32, %arg2: memref<16x128xf32, #tpu.memory_space<vmem>>, %arg3: memref<16x128xf32, #tpu.memory_space<vmem>>, %arg4: memref<1x8x128xf32, #tpu.memory_space<vmem>>, %arg5: memref<8x128xf32, #tpu.memory_space<vmem>>) attributes {dimension_semantics = [#tpu.dimension_semantics<parallel>, #tpu.dimension_semantics<arbitrary>], iteration_bounds = array<i64: 1, 1>, scalar_prefetch = 0 : i64, scratch_operands = 1 : i64, tpu.core_type = #tpu.core_type<tc>, window_params = [{transform_indices = @transform_0, window_bounds = array<i64: 16, 128>}, {transform_indices = @transform_1, window_bounds = array<i64: 16, 128>}, {transform_indices = @transform_2, window_bounds = array<i64: 1, 8, 128>}]} {
    %c0_i32 = arith.constant 0 : i32
    %0 = arith.cmpi eq, %arg1, %c0_i32 : i32
    %1 = arith.extui %0 : i1 to i32
    %c0_i32_0 = arith.constant 0 : i32
    %2 = arith.cmpi ne, %1, %c0_i32_0 : i32
    scf.if %2 {
      %cst_17 = arith.constant 0.000000e+00 : f32
      %44 = vector.broadcast %cst_17 : f32 to vector<8x128xf32>
      %c0_18 = arith.constant 0 : index
      %c0_19 = arith.constant 0 : index
      %45 = vector.load %arg5[%c0_18, %c0_19] : memref<8x128xf32, #tpu.memory_space<vmem>>, vector<8x128xf32>
      tpu.vector_store %arg5[%c0_18, %c0_19], %44 {strides = array<i32>} : memref<8x128xf32, #tpu.memory_space<vmem>>, vector<8x128xf32>,
    } else {
    }
    %c0 = arith.constant 0 : index
    %c0_1 = arith.constant 0 : index
    %3 = vector.load %arg2[%c0, %c0_1] : memref<16x128xf32, #tpu.memory_space<vmem>>, vector<16x128xf32>
    %c0_2 = arith.constant 0 : index
    %c0_3 = arith.constant 0 : index
    %4 = vector.load %arg3[%c0_2, %c0_3] : memref<16x128xf32, #tpu.memory_space<vmem>>, vector<16x128xf32>
    %5 = math.absf %3 : vector<16x128xf32>
    %cst = arith.constant 0.000000e+00 : f32
    %6 = vector.broadcast %cst : f32 to vector<16x128xf32>
    %7 = arith.subf %6, %5 : vector<16x128xf32>
    %8 = math.exp %7 : vector<16x128xf32>
    %cst_4 = arith.constant 0.000000e+00 : f32
    %9 = vector.broadcast %cst_4 : f32 to vector<16x128xf32>
    %10 = arith.maximumf %3, %9 : vector<16x128xf32>
    %11 = arith.mulf %3, %4 : vector<16x128xf32>
    %12 = arith.subf %10, %11 : vector<16x128xf32>
    %13 = math.log1p %8 : vector<16x128xf32>
    %14 = arith.addf %12, %13 : vector<16x128xf32>
    %cst_5 = arith.constant 5.000000e-01 : f32
    %15 = vector.broadcast %cst_5 : f32 to vector<16x128xf32>
    %16 = arith.mulf %15, %3 : vector<16x128xf32>
    %17 = math.tanh %16 : vector<16x128xf32>
    %cst_6 = arith.constant 5.000000e-01 : f32
    %18 = vector.broadcast %cst_6 : f32 to vector<16x128xf32>
    %19 = arith.mulf %18, %17 : vector<16x128xf32>
    %cst_7 = arith.constant 5.000000e-01 : f32
    %20 = vector.broadcast %cst_7 : f32 to vector<16x128xf32>
    %21 = arith.addf %19, %20 : vector<16x128xf32>
    %22 = arith.subf %21, %4 : vector<16x128xf32>
    %cst_8 = arith.constant 1.000000e+00 : f32
    %23 = vector.broadcast %cst_8 : f32 to vector<16x128xf32>
    %24 = arith.subf %22, %23 : vector<16x128xf32>
    %cst_9 = arith.constant 19.9600792 : f32
    %25 = vector.broadcast %cst_9 : f32 to vector<16x128xf32>
    %26 = arith.mulf %24, %25 : vector<16x128xf32>
    %27 = math.exp %26 : vector<16x128xf32>
    %cst_10 = arith.constant 1.000000e+00 : f32
    %28 = vector.broadcast %cst_10 : f32 to vector<16x128xf32>
    %29 = arith.subf %28, %27 : vector<16x128xf32>
    %30 = arith.mulf %14, %29 : vector<16x128xf32>
    %c1_i32 = arith.constant 1 : i32
    %31 = arith.muli %arg0, %c1_i32 : i32
    %32 = arith.addi %31, %arg1 : i32
    %c2048_i32 = arith.constant 2048 : i32
    %33 = arith.muli %32, %c2048_i32 : i32
    %c2048_i32_11 = arith.constant 2048 : i32
    %34 = arith.subi %c2048_i32_11, %33 : i32
    %c2048_i32_12 = arith.constant 2048 : i32
    %35 = arith.cmpi slt, %34, %c2048_i32_12 : i32
    %36 = arith.extui %35 : i1 to i32
    %c0_i32_13 = arith.constant 0 : i32
    %37 = arith.cmpi ne, %36, %c0_i32_13 : i32
    scf.if %37 {
      %44 = tpu.iota {dimensions = array<i32: 0>} : vector<16x128xi32>
      %45 = tpu.iota {dimensions = array<i32: 1>} : vector<16x128xi32>
      %c128_i32 = arith.constant 128 : i32
      %46 = vector.broadcast %c128_i32 : i32 to vector<16x128xi32>
      %47 = arith.muli %44, %46 : vector<16x128xi32>
      %48 = arith.addi %47, %45 : vector<16x128xi32>
      %c0_17 = arith.constant 0 : index
      %c0_18 = arith.constant 0 : index
      %49 = vector.load %arg5[%c0_17, %c0_18] : memref<8x128xf32, #tpu.memory_space<vmem>>, vector<8x128xf32>
      %50 = vector.broadcast %34 : i32 to vector<16x128xi32>
      %51 = arith.cmpi slt, %48, %50 : vector<16x128xi32>
      %cst_19 = arith.constant 0.000000e+00 : f32
      %52 = vector.broadcast %cst_19 : f32 to vector<16x128xf32>
      %53 = arith.select %51, %30, %52 : vector<16x128xi1>, vector<16x128xf32>
      %54 = vector.shape_cast %53 : vector<16x128xf32> to vector<2x8x128xf32>
      %cst_20 = arith.constant dense<0.000000e+00> : vector<8x128xf32>
      %55 = vector.multi_reduction <add>, %54, %cst_20 [0] : vector<2x8x128xf32> to vector<8x128xf32>
      %56 = arith.addf %49, %55 : vector<8x128xf32>
      %c0_21 = arith.constant 0 : index
      %c0_22 = arith.constant 0 : index
      %57 = vector.load %arg5[%c0_21, %c0_22] : memref<8x128xf32, #tpu.memory_space<vmem>>, vector<8x128xf32>
      tpu.vector_store %arg5[%c0_21, %c0_22], %56 {strides = array<i32>} : memref<8x128xf32, #tpu.memory_space<vmem>>, vector<8x128xf32>,
    } else {
    }
    %true = arith.constant true
    %38 = arith.xori %35, %true : i1
    %39 = arith.extui %38 : i1 to i32
    %c0_i32_14 = arith.constant 0 : i32
    %40 = arith.cmpi ne, %39, %c0_i32_14 : i32
    scf.if %40 {
      %c0_17 = arith.constant 0 : index
      %c0_18 = arith.constant 0 : index
      %44 = vector.load %arg5[%c0_17, %c0_18] : memref<8x128xf32, #tpu.memory_space<vmem>>, vector<8x128xf32>
      %45 = vector.shape_cast %30 : vector<16x128xf32> to vector<2x8x128xf32>
      %cst_19 = arith.constant dense<0.000000e+00> : vector<8x128xf32>
      %46 = vector.multi_reduction <add>, %45, %cst_19 [0] : vector<2x8x128xf32> to vector<8x128xf32>
      %47 = arith.addf %44, %46 : vector<8x128xf32>
      %c0_20 = arith.constant 0 : index
      %c0_21 = arith.constant 0 : index
      %48 = vector.load %arg5[%c0_20, %c0_21] : memref<8x128xf32, #tpu.memory_space<vmem>>, vector<8x128xf32>
      tpu.vector_store %arg5[%c0_20, %c0_21], %47 {strides = array<i32>} : memref<8x128xf32, #tpu.memory_space<vmem>>, vector<8x128xf32>,
    } else {
    }
    %c0_i32_15 = arith.constant 0 : i32
    %41 = arith.cmpi eq, %arg1, %c0_i32_15 : i32
    %42 = arith.extui %41 : i1 to i32
    %c0_i32_16 = arith.constant 0 : i32
    %43 = arith.cmpi ne, %42, %c0_i32_16 : i32
    scf.if %43 {
      %c0_17 = arith.constant 0 : index
      %c0_18 = arith.constant 0 : index
      %44 = vector.load %arg5[%c0_17, %c0_18] : memref<8x128xf32, #tpu.memory_space<vmem>>, vector<8x128xf32>
      %45 = vector.shape_cast %44 : vector<8x128xf32> to vector<1x8x128xf32>
      %c0_19 = arith.constant 0 : index
      %c0_20 = arith.constant 0 : index
      %c0_21 = arith.constant 0 : index
      %46 = vector.load %arg4[%c0_19, %c0_20, %c0_21] : memref<1x8x128xf32, #tpu.memory_space<vmem>>, vector<1x8x128xf32>
      tpu.vector_store %arg4[%c0_19, %c0_20, %c0_21], %45 {strides = array<i32>} : memref<1x8x128xf32, #tpu.memory_space<vmem>>, vector<1x8x128xf32>,
    } else {
    }
    return
  }
  func.func @transform_0(%arg0: i32, %arg1: i32) -> (i32, i32) {
    %c1_i32 = arith.constant 1 : i32
    %0 = arith.muli %arg0, %c1_i32 : i32
    %1 = arith.addi %0, %arg1 : i32
    %c0_i32 = arith.constant 0 : i32
    %2 = arith.minsi %1, %c0_i32 : i32
    %c0_i32_0 = arith.constant 0 : i32
    %c0_i32_1 = arith.constant 0 : i32
    return %2, %c0_i32_0 : i32, i32
  }
  func.func @transform_1(%arg0: i32, %arg1: i32) -> (i32, i32) {
    %c1_i32 = arith.constant 1 : i32
    %0 = arith.muli %arg0, %c1_i32 : i32
    %1 = arith.addi %0, %arg1 : i32
    %c0_i32 = arith.constant 0 : i32
    %2 = arith.minsi %1, %c0_i32 : i32
    %c0_i32_0 = arith.constant 0 : i32
    %c0_i32_1 = arith.constant 0 : i32
    return %2, %c0_i32_0 : i32, i32
  }
  func.func @transform_2(%arg0: i32, %arg1: i32) -> (i32, i32, i32) {
    %c0_i32 = arith.constant 0 : i32
    %c0_i32_0 = arith.constant 0 : i32
    %c0_i32_1 = arith.constant 0 : i32
    return %arg0, %c0_i32, %c0_i32_0 : i32, i32, i32
  }
}

</mosaic_0001>

<bundles_post_ra>
// kernel: tpu_custom_call.1
= control target key start
LH: loop header
LB: loop body
LE: loop exit
PB: predicated region body
PF: predicated region fallthrough
CT: control target
= control target key end

     0   :  { %7 = vsyncpa [#allocation4], 0  ;;  %s334_s0 = inlined_call_operand.hbm [shape: f32[16,128], index: 0, kind: input, shape index: {}]   ;;  %s335_s1 = inlined_call_operand.hbm [shape: f32[16,128], index: 1, kind: input, shape index: {}]   ;;  %s336_s2 = inlined_call_operand.hbm [shape: f32[1,8,128], index: 2, kind: output, shape index: {}]  }
   0x1   :  { %8 = vsyncpa [#allocation7], 0 }
   0x2   :  { %9 = vsyncpa [#allocation5], 0  ;;  %s278_s9 = smov [#allocation3]   ;;  %s206_s13 = scalar_lea.hbm %s334_s0, 256 }
   0x3   :  { %s21_s10 = sshll.u32 %s278_s9, 4  ;;  %p207_p0 = scmp.ne.s32.totalorder %s334_s0, %s206_s13  ;;  %s22_s10 = int_to_ptr.vmem [resolvable:$true] %s21_s10 }
   0x4   :  { %p210_p1 = scmp.lt.u32.totalorder %s206_s13, %s334_s0 }
   0x6   :  { %p212_p2 = pnand %p210_p1, %p207_p0 }
   0x8   :  { %215 = shalt.err (!%p212_p2)
}
   0x9   :  { %s216_s18 = scalar_lea.vmem %s22_s10, 256  ;;  %p221_p4 = scmp.lt.s32.totalorder %s22_s10, %s22_s10 }
   0xa   :  { %p217_p3 = scmp.ne.s32.totalorder %s22_s10, %s216_s18  ;;  %p222_p5 = scmp.lt.s32.totalorder %s216_s18, %s216_s18 }
   0xc   :  { %p223_p6 = por %p222_p5, %p221_p4 }
   0xe   :  { %p224_p7 = pnand %p223_p6, %p217_p3 }
  0x10   :  { %227 = shalt.err (!%p224_p7)
}
  0x11   :  { %s279_s19 = smov 128   ;;  %s280_s20 = smov 8  }
  0x12   :  { %27 = dma.hbm_to_vmem [thread:$0]  %s334_s0, 256, %s22_s10, [#allocation4], %s279_s19, %s279_s19, %s280_s20  }
  0x13   :  { %s281_s23 = smov [#allocation6]   ;;  %s228_s27 = scalar_lea.hbm %s335_s1, 256 }
  0x14   :  { %s39_s24 = sshll.u32 %s281_s23, 4  ;;  %p229_p8 = scmp.ne.s32.totalorder %s335_s1, %s228_s27  ;;  %s40_s24 = int_to_ptr.vmem [resolvable:$true] %s39_s24 }
  0x15   :  { %p232_p9 = scmp.lt.u32.totalorder %s228_s27, %s335_s1 }
  0x17   :  { %p234_p10 = pnand %p232_p9, %p229_p8 }
  0x19   :  { %237 = shalt.err (!%p234_p10)
}
  0x1a   :  { %s238_s4 = scalar_lea.vmem %s40_s24, 256  ;;  %p243_p12 = scmp.lt.s32.totalorder %s40_s24, %s40_s24 }
  0x1b   :  { %p239_p11 = scmp.ne.s32.totalorder %s40_s24, %s238_s4  ;;  %p244_p13 = scmp.lt.s32.totalorder %s238_s4, %s238_s4 }
  0x1d   :  { %p245_p0 = por %p244_p13, %p243_p12 }
  0x1f   :  { %p246_p1 = pnand %p245_p0, %p239_p11 }
  0x21   :  { %249 = shalt.err (!%p246_p1)
}
  0x22   :  { %45 = dma.hbm_to_vmem [thread:$0]  %s335_s1, 256, %s40_s24, [#allocation7], %s279_s19, %s279_s19, %s280_s20  }
  0x23   :  { %272 = dma.done.wait [#allocation4], 256  }
  0x24   :  { %273 = vsyncadd [#allocation4], 4294967040 }
  0x25   :  { %274 = dma.done.wait [#allocation7], 256  }
  0x26   :  { %275 = vsyncadd [#allocation7], 4294967040  ;;  %v65_v0 = vld [vmem:[#allocation3] sm:$0xff]  ;;  %v66_v1 = vld [vmem:[#allocation3 + $0x8] sm:$0xff]  ;;  %s282_s1 = smov [#allocation8]  }
  0x27   :  { %v69_v2 = vand.u32 2147483647, %v65_v0  ;;  %v70_v3 = vand.u32 2147483647, %v66_v1  ;;  %v103_v4 = vmul.f32 0.5, %v65_v0  ;;  %v104_v5 = vmul.f32 0.5, %v66_v1 }
  0x28   :  { %v67_v13 = vld [vmem:[#allocation6] sm:$0xff]  ;;  %v68_v16 = vld [vmem:[#allocation6 + $0x8] sm:$0xff]  ;;  %v77_v36 = vmax.f32 %v65_v0, 0.0  ;;  %v78_v38 = vmax.f32 %v66_v1, 0.0  ;;  %s169_s6 = sshll.u32 %s282_s1, 4  ;;  %s170_s6 = int_to_ptr.vmem [resolvable:$true] %s169_s6 }
  0x29   :  { %v71_v6 = vsub.f32 0.0, %v69_v2  ;;  %v72_v7 = vsub.f32 0.0, %v70_v3  ;;  %190 = vtanh.f32 %v103_v4  ;;  %v79_v37 = vmul.f32 %v67_v13, %v65_v0  ;;  %s250_s7 = scalar_lea.vmem %s170_s6, 128  ;;  %p255_p3 = scmp.lt.s32.totalorder %s170_s6, %s170_s6 }
  0x2a   :  { %192 = vtanh.f32 %v104_v5  ;;  %v80_v39 = vmul.f32 %v68_v16, %v66_v1  ;;  %p251_p2 = scmp.ne.s32.totalorder %s170_s6, %s250_s7  ;;  %p256_p4 = scmp.lt.s32.totalorder %s250_s7, %s250_s7 }
  0x2b   :  { %v73_v8 = vmul.f32 1.442695, %v71_v6  ;;  %v75_v9 = vmul.f32 1.442695, %v72_v7  ;;  %v81_v45 = vsub.f32 %v77_v36, %v79_v37 }
  0x2c   :  { %v82_v47 = vsub.f32 %v78_v38, %v80_v39  ;;  %p257_p5 = por %p256_p4, %p255_p3 }
  0x2d   :  { %194 = vpow2.f32 %v73_v8 }
  0x2e   :  { %196 = vpow2.f32 %v75_v9  ;;  %p258_p6 = pnand %p257_p5, %p251_p2 }
  0x33   :  { %v191_v10 = vpop.eup %190 }
  0x34   :  { %v193_v11 = vpop.eup %192  ;;  %v107_v12 = vmul.f32 0.5, %v191_v10 }
  0x35   :  { %v108_v14 = vmul.f32 0.5, %v193_v11 }
  0x36   :  { %v109_v17 = vadd.f32 0.5, %v107_v12 }
  0x37   :  { %v195_v15 = vpop.eup %194  ;;  %v110_v20 = vadd.f32 0.5, %v108_v14 }
  0x38   :  { %v197_v18 = vpop.eup %196  ;;  %v83_v19 = vadd.f32 1.0, %v195_v15  ;;  %v111_v22 = vsub.f32 %v109_v17, %v67_v13  ;;  %v86_v24 = vmul.f32 -0.5, %v195_v15  ;;  %v89_v32 = vand.u32 2147483647, %v195_v15 }
  0x39   :  { %v92_v21 = vadd.f32 1.0, %v197_v18  ;;  %v112_v23 = vsub.f32 %v110_v20, %v68_v16  ;;  %v95_v26 = vmul.f32 -0.5, %v197_v18  ;;  %v98_v35 = vand.u32 2147483647, %v197_v18 }
  0x3a   :  { %198 = vlog2.f32 %v83_v19  ;;  %v183_v25 = vadd.f32 -1.0, %v111_v22  ;;  %v87_v30 = vadd.f32 1.0, %v86_v24  ;;  %vm90_vm0 = vcmp.lt.f32.partialorder %v89_v32, 0.0004427343 }
  0x3b   :  { %200 = vlog2.f32 %v92_v21  ;;  %v184_v27 = vadd.f32 -1.0, %v112_v23  ;;  %v96_v33 = vadd.f32 1.0, %v95_v26  ;;  %vm99_vm1 = vcmp.lt.f32.partialorder %v98_v35, 0.0004427343 }
  0x3c   :  { %v115_v28 = vmul.f32 19.96008, %v183_v25  ;;  %v88_v40 = vmul.f32 %v195_v15, %v87_v30 }
  0x3d   :  { %v116_v29 = vmul.f32 19.96008, %v184_v27  ;;  %v97_v42 = vmul.f32 %v197_v18, %v96_v33 }
  0x3e   :  { %v117_v31 = vmul.f32 1.442695, %v115_v28 }
  0x3f   :  { %v119_v34 = vmul.f32 1.442695, %v116_v29 }
  0x40   :  { %202 = vpow2.f32 %v117_v31 }
  0x41   :  { %204 = vpow2.f32 %v119_v34 }
  0x44   :  { %v199_v41 = vpop.eup %198 }
  0x45   :  { %v201_v43 = vpop.eup %200  ;;  %v85_v44 = vmul.f32 0.6931472, %v199_v41 }
  0x46   :  { %v94_v46 = vmul.f32 0.6931472, %v201_v43 }
  0x47   :  { %v91_v48 = vsel %vm90_vm0, %v88_v40, %v85_v44 }
  0x48   :  { %v100_v49 = vsel %vm99_vm1, %v97_v42, %v94_v46  ;;  %v101_v50 = vadd.f32 %v91_v48, %v81_v45 }
  0x49   :  { %v102_v52 = vadd.f32 %v100_v49, %v82_v47 }
  0x4a   :  { %v203_v51 = vpop.eup %202 }
  0x4b   :  { %v205_v53 = vpop.eup %204  ;;  %v121_v54 = vsub.f32 1.0, %v203_v51 }
  0x4c   :  { %v122_v55 = vsub.f32 1.0, %v205_v53 }
  0x4d   :  { %v123_v56 = vmul.f32 %v121_v54, %v101_v50 }
  0x4e   :  { %v124_v57 = vmul.f32 %v122_v55, %v102_v52 }
  0x50   :  { %v155_v58 = vadd.f32 %v124_v57, %v123_v56 }
  0x52   :  { %162 = vst [vmem:[#allocation8] sm:$0xff] %v155_v58 }
  0x53   :  { %261 = shalt.err (!%p258_p6)
}
  0x54   :  { %s262_s10 = scalar_lea.hbm %s336_s2, 128 }
  0x55   :  { %p263_p7 = scmp.ne.s32.totalorder %s336_s2, %s262_s10  ;;  %p266_p8 = scmp.lt.u32.totalorder %s262_s10, %s336_s2 }
  0x57   :  { %p268_p9 = pnand %p266_p8, %p263_p7 }
  0x59   :  { %271 = shalt.err (!%p268_p9)
}
  0x5a   :  { %172 = dma.vmem_to_hbm [thread:$0]  %s170_s6, 128, %s336_s2, [#allocation5]  }
  0x5b   :  { %276 = dma.done.wait [#allocation5], 128  }
  0x5c   :  { %277 = vsyncadd [#allocation5], 4294967168 }
  0x5d   :  { %176 = vsyncpa [#allocation4], 1 }
  0x5e   :  { %177 = vsyncpa [#allocation7], 1 }
  0x5f   :  { %178 = vsyncpa [#allocation5], 1 }

</bundles_post_ra>
